<compile_context>
chip_gen: v6e
topology: v6e:2x2x1
jax: 0.10.0
libtpu: 0.0.40
codegen_flags: <defaults>
</compile_context>

<pallas_src>
import jax
import jax.numpy as jnp
from jax.experimental import pallas as pl
from jax.experimental.pallas import tpu as pltpu


def _reparam_kernel(mu_ref, logvar_ref, eps_ref, z_ref):
    # Do the math in f32 (v5e VPU/EUP have no bf16 path); cast on store only.
    mu = mu_ref[...].astype(jnp.float32)
    logvar = logvar_ref[...].astype(jnp.float32)
    eps = eps_ref[...].astype(jnp.float32)

    std = jnp.exp(0.5 * logvar)          # EUP transcendental, 1 per element
    z_ref[...] = (eps * std + mu).astype(z_ref.dtype)


def reparametrize(mu, logvar, *, training=True, key=None):
    """Pallas implementation of Reparametrize.forward.

    mu, logvar: [B, D] arrays (D is the lane axis; any D works since the
    block keeps the full D extent).
    training=True  -> z = randn_like(std) * exp(0.5*logvar) + mu
    training=False -> z = mu
    """
    assert mu.shape == logvar.shape
    if not training:
        # Eval path is the identity on mu; no kernel needed.
        return mu

    if key is None:
        key = jax.random.PRNGKey(0)

    B, D = mu.shape
    # torch.randn_like(std, dtype=torch.float32): noise is always f32.
    eps = jax.random.normal(key, (B, D), dtype=jnp.float32)

    # ---- Row-tile selection -------------------------------------------------
    # Target ~2 MiB per array tile.  With 3 inputs + 1 output, double
    # buffered, that is ~16 MiB of live VMEM - safe on v5e (with the raised
    # limit below), v6e and v7x, while still being large enough to amortize
    # the ~0.35 us per-grid-step overhead.
    row_bytes = D * 4
    tile_budget_bytes = 2 * 1024 * 1024
    tb = max(1, tile_budget_bytes // row_bytes)
    if tb >= B:
        tb = B                               # single full block along rows
    else:
        tb = max(8, (tb // 8) * 8)           # sublane-aligned partial tiles
    grid = (pl.cdiv(B, tb),)

    spec = pl.BlockSpec((tb, D), lambda i: (i, 0))

    n = B * D
    cost = pl.CostEstimate(
        flops=3 * n,              # 0.5*logvar, eps*std, +mu
        transcendentals=n,        # one exp per element
        bytes_accessed=16 * n,    # 3 f32 reads + 1 f32 write per element
    )

    return pl.pallas_call(
        _reparam_kernel,
        out_shape=jax.ShapeDtypeStruct((B, D), mu.dtype),
        grid=grid,
        in_specs=[spec, spec, spec],
        out_specs=spec,
        compiler_params=pltpu.CompilerParams(
            dimension_semantics=("parallel",),   # megacore-split the row tiles
            vmem_limit_bytes=32 * 1024 * 1024,
        ),
        cost_estimate=cost,
    )(mu, logvar, eps)


if __name__ == "__main__":
    key = jax.random.PRNGKey(0)
    k_mu, k_lv, k_eps = jax.random.split(key, 3)

    B, D = 8, 256  # small latent batch
    mu = jax.random.normal(k_mu, (B, D), dtype=jnp.float32)
    logvar = jax.random.normal(k_lv, (B, D), dtype=jnp.float32) * 0.1

    # Training path (stochastic): z = eps * exp(0.5*logvar) + mu
    z_train = reparametrize(mu, logvar, training=True, key=k_eps)
    jax.block_until_ready(z_train)
    assert z_train.shape == mu.shape and z_train.dtype == mu.dtype
    assert bool(jnp.all(jnp.isfinite(z_train)))

    # Deterministic reference check (same key -> same eps).
    eps_ref = jax.random.normal(k_eps, (B, D), dtype=jnp.float32)
    std = jnp.exp(0.5 * logvar)
    z_ref = eps_ref * std + mu
    assert bool(jnp.allclose(z_train, z_ref, atol=1e-5, rtol=1e-5))

    # Eval path: z == mu exactly.
    z_eval = reparametrize(mu, logvar, training=False)
    jax.block_until_ready(z_eval)
    assert bool(jnp.all(z_eval == mu))

    print("KERNEL_OK")
</pallas_src>

<mosaic_0001>
module attributes {stable_mosaic.version = 11 : i64} {
  func.func @_reparam_kernel(%arg0: i32, %arg1: memref<8x256xf32, #tpu.memory_space<vmem>>, %arg2: memref<8x256xf32, #tpu.memory_space<vmem>>, %arg3: memref<8x256xf32, #tpu.memory_space<vmem>>, %arg4: memref<8x256xf32, #tpu.memory_space<vmem>>) attributes {dimension_semantics = [#tpu.dimension_semantics<parallel>], iteration_bounds = array<i64: 1>, scalar_prefetch = 0 : i64, scratch_operands = 0 : i64, tpu.core_type = #tpu.core_type<tc>, window_params = [{transform_indices = @transform_0, window_bounds = array<i64: 8, 256>}, {transform_indices = @transform_1, window_bounds = array<i64: 8, 256>}, {transform_indices = @transform_2, window_bounds = array<i64: 8, 256>}, {transform_indices = @transform_3, window_bounds = array<i64: 8, 256>}]} {
    %c0 = arith.constant 0 : index
    %c0_0 = arith.constant 0 : index
    %0 = vector.load %arg1[%c0, %c0_0] : memref<8x256xf32, #tpu.memory_space<vmem>>, vector<8x256xf32>
    %c0_1 = arith.constant 0 : index
    %c0_2 = arith.constant 0 : index
    %1 = vector.load %arg2[%c0_1, %c0_2] : memref<8x256xf32, #tpu.memory_space<vmem>>, vector<8x256xf32>
    %c0_3 = arith.constant 0 : index
    %c0_4 = arith.constant 0 : index
    %2 = vector.load %arg3[%c0_3, %c0_4] : memref<8x256xf32, #tpu.memory_space<vmem>>, vector<8x256xf32>
    %cst = arith.constant 5.000000e-01 : f32
    %3 = vector.broadcast %cst : f32 to vector<8x256xf32>
    %4 = arith.mulf %3, %1 : vector<8x256xf32>
    %5 = math.exp %4 : vector<8x256xf32>
    %6 = arith.mulf %2, %5 : vector<8x256xf32>
    %7 = arith.addf %6, %0 : vector<8x256xf32>
    %c0_5 = arith.constant 0 : index
    %c0_6 = arith.constant 0 : index
    %8 = vector.load %arg4[%c0_5, %c0_6] : memref<8x256xf32, #tpu.memory_space<vmem>>, vector<8x256xf32>
    tpu.vector_store %arg4[%c0_5, %c0_6], %7 {strides = array<i32>} : memref<8x256xf32, #tpu.memory_space<vmem>>, vector<8x256xf32>,
    return
  }
  func.func @transform_0(%arg0: i32) -> (i32, i32) {
    %c0_i32 = arith.constant 0 : i32
    %c0_i32_0 = arith.constant 0 : i32
    return %arg0, %c0_i32 : i32, i32
  }
  func.func @transform_1(%arg0: i32) -> (i32, i32) {
    %c0_i32 = arith.constant 0 : i32
    %c0_i32_0 = arith.constant 0 : i32
    return %arg0, %c0_i32 : i32, i32
  }
  func.func @transform_2(%arg0: i32) -> (i32, i32) {
    %c0_i32 = arith.constant 0 : i32
    %c0_i32_0 = arith.constant 0 : i32
    return %arg0, %c0_i32 : i32, i32
  }
  func.func @transform_3(%arg0: i32) -> (i32, i32) {
    %c0_i32 = arith.constant 0 : i32
    %c0_i32_0 = arith.constant 0 : i32
    return %arg0, %c0_i32 : i32, i32
  }
}

</mosaic_0001>

<bundles_post_ra>
// kernel: tpu_custom_call.1
= control target key start
LH: loop header
LB: loop body
LE: loop exit
PB: predicated region body
PF: predicated region fallthrough
CT: control target
= control target key end

     0   :  { %8 = vsyncpa [#allocation3], 0  ;;  %s214_s0 = inlined_call_operand.hbm [shape: f32[8,256], index: 0, kind: input, shape index: {}]   ;;  %s215_s1 = inlined_call_operand.hbm [shape: f32[8,256], index: 1, kind: input, shape index: {}]   ;;  %s216_s2 = inlined_call_operand.hbm [shape: f32[8,256], index: 2, kind: input, shape index: {}]   ;;  %s217_s3 = inlined_call_operand.hbm [shape: f32[8,256], index: 3, kind: output, shape index: {}]  }
   0x1   :  { %9 = vsyncpa [#allocation6], 0 }
   0x2   :  { %10 = vsyncpa [#allocation4], 0  ;;  %s178_s12 = smov [#allocation5]   ;;  %s179_s14 = smov [#allocation2]  }
   0x3   :  { %s27_s13 = sshll.u32 %s178_s12, 4  ;;  %s17_s15 = sshll.u32 %s179_s14, 4  ;;  %s28_s13 = int_to_ptr.vmem [resolvable:$true] %s27_s13  ;;  %s18_s15 = int_to_ptr.vmem [resolvable:$true] %s17_s15 }
   0x4   :  { %s100_s16 = scalar_lea.vmem %s28_s13, 256  ;;  %p105_p1 = scmp.lt.s32.totalorder %s28_s13, %s28_s13 }
   0x5   :  { %p101_p0 = scmp.ne.s32.totalorder %s28_s13, %s100_s16  ;;  %p106_p2 = scmp.lt.s32.totalorder %s100_s16, %s100_s16 }
   0x7   :  { %p107_p3 = por %p106_p2, %p105_p1 }
   0x9   :  { %p108_p4 = pnand %p107_p3, %p101_p0 }
   0xb   :  { %111 = shalt.err (!%p108_p4)
}
   0xc   :  { %30 = dma.hbm_to_vmem [thread:$0]  %s215_s1, 256, %s28_s13, [#allocation6]  }
   0xd   :  { %s120_s19 = scalar_lea.vmem %s18_s15, 256  ;;  %p125_p6 = scmp.lt.s32.totalorder %s18_s15, %s18_s15 }
   0xe   :  { %p121_p5 = scmp.ne.s32.totalorder %s18_s15, %s120_s19  ;;  %p126_p7 = scmp.lt.s32.totalorder %s120_s19, %s120_s19 }
  0x10   :  { %p127_p8 = por %p126_p7, %p125_p6 }
  0x12   :  { %p128_p9 = pnand %p127_p8, %p121_p5 }
  0x14   :  { %131 = shalt.err (!%p128_p9)
}
  0x15   :  { %20 = dma.hbm_to_vmem [thread:$0]  %s214_s0, 256, %s18_s15, [#allocation3]  }
  0x16   :  { %s180_s22 = smov [#allocation7]  }
  0x17   :  { %s37_s23 = sshll.u32 %s180_s22, 4  ;;  %s38_s23 = int_to_ptr.vmem [resolvable:$true] %s37_s23 }
  0x18   :  { %s140_s24 = scalar_lea.vmem %s38_s23, 256  ;;  %p145_p11 = scmp.lt.s32.totalorder %s38_s23, %s38_s23 }
  0x19   :  { %p141_p10 = scmp.ne.s32.totalorder %s38_s23, %s140_s24  ;;  %p146_p12 = scmp.lt.s32.totalorder %s140_s24, %s140_s24 }
  0x1b   :  { %p147_p13 = por %p146_p12, %p145_p11 }
  0x1d   :  { %p148_p0 = pnand %p147_p13, %p141_p10 }
  0x1f   :  { %151 = shalt.err (!%p148_p0)
}
  0x20   :  { %40 = dma.hbm_to_vmem [thread:$0]  %s216_s2, 256, %s38_s23, [#allocation6]  }
  0x21   :  { %172 = dma.done.wait [#allocation3], 256  }
  0x22   :  { %173 = vsyncadd [#allocation3], 4294967040 }
  0x23   :  { %174 = dma.done.wait [#allocation6], 512  }
  0x24   :  { %175 = vsyncadd [#allocation6], 4294966784  ;;  %v52_v0 = vld [vmem:[#allocation5] sm:$0xff]  ;;  %v53_v2 = vld [vmem:[#allocation5 + $0x8] sm:$0xff]  ;;  %s181_s0 = smov [#allocation8]  }
  0x25   :  { %v56_v1 = vmul.f32 0.5, %v52_v0  ;;  %v57_v3 = vmul.f32 0.5, %v53_v2  ;;  %v54_v6 = vld [vmem:[#allocation7] sm:$0xff]  ;;  %v55_v7 = vld [vmem:[#allocation7 + $0x8] sm:$0xff]  ;;  %s74_s2 = sshll.u32 %s181_s0, 4  ;;  %s75_s2 = int_to_ptr.vmem [resolvable:$true] %s74_s2 }
  0x26   :  { %v50_v9 = vld [vmem:[#allocation2] sm:$0xff]  ;;  %v51_v12 = vld [vmem:[#allocation2 + $0x8] sm:$0xff]  ;;  %s152_s26 = scalar_lea.vmem %s75_s2, 256  ;;  %p157_p2 = scmp.lt.s32.totalorder %s75_s2, %s75_s2 }
  0x27   :  { %v58_v4 = vmul.f32 1.442695, %v56_v1  ;;  %v60_v5 = vmul.f32 1.442695, %v57_v3  ;;  %p153_p1 = scmp.ne.s32.totalorder %s75_s2, %s152_s26  ;;  %p158_p3 = scmp.lt.s32.totalorder %s152_s26, %s152_s26 }
  0x29   :  { %88 = vpow2.f32 %v58_v4  ;;  %p159_p4 = por %p158_p3, %p157_p2 }
  0x2a   :  { %90 = vpow2.f32 %v60_v5 }
  0x2b   :  { %p160_p5 = pnand %p159_p4, %p153_p1 }
  0x36   :  { %v89_v8 = vpop.eup %88 }
  0x37   :  { %v91_v10 = vpop.eup %90  ;;  %v62_v11 = vmul.f32 %v89_v8, %v54_v6 }
  0x38   :  { %v63_v13 = vmul.f32 %v91_v10, %v55_v7 }
  0x39   :  { %v64_v14 = vadd.f32 %v62_v11, %v50_v9 }
  0x3a   :  { %v65_v15 = vadd.f32 %v63_v13, %v51_v12 }
  0x3b   :  { %66 = vst [vmem:[#allocation8] sm:$0xff] %v64_v14 }
  0x3c   :  { %67 = vst [vmem:[#allocation8 + $0x8] sm:$0xff] %v65_v15 }
  0x3d   :  { %163 = shalt.err (!%p160_p5)
}
  0x3e   :  { %77 = dma.vmem_to_hbm [thread:$0]  %s75_s2, 256, %s217_s3, [#allocation4]  }
  0x3f   :  { %176 = dma.done.wait [#allocation4], 256  }
  0x40   :  { %177 = vsyncadd [#allocation4], 4294967040 }
  0x41   :  { %81 = vsyncpa [#allocation3], 1 }
  0x42   :  { %82 = vsyncpa [#allocation6], 1 }
  0x43   :  { %83 = vsyncpa [#allocation4], 1 }

</bundles_post_ra>
